<compile_context>
chip_gen: v7x
topology: tpu7x:2x2x1
jax: 0.10.0
libtpu: 0.0.40
codegen_flags: <defaults>
</compile_context>

<pallas_src>
import functools

import jax
import jax.numpy as jnp
from jax import lax
from jax.experimental import pallas as pl
from jax.experimental.pallas import tpu as pltpu


def ann_kernel(x_ref, w1_ref, b1_ref, wh_ref, bh_ref, out_ref):
    # Hidden layer: Linear + ReLU (fc0 / act0).  f32 accumulation on the MXU.
    h = jnp.dot(x_ref[...], w1_ref[...], preferred_element_type=jnp.float32)
    h = jnp.maximum(h + b1_ref[...], 0.0)

    # Fused heads: one (tb, H) x (H, 2) matmul.  Column 0 = cls, column 1 = reg.
    logits = jnp.dot(h, wh_ref[...],
                     preferred_element_type=jnp.float32) + bh_ref[...]

    # Apply sigmoid only to the classification column (lane 0).
    col = lax.broadcasted_iota(jnp.int32, logits.shape, 1)
    out = jnp.where(col == 0, jax.nn.sigmoid(logits), logits)
    out_ref[...] = out.astype(out_ref.dtype)


def _round_up(n, m):
    return ((n + m - 1) // m) * m


@functools.lru_cache(maxsize=None)
def _vmem_capacity_bytes():
    """Physical VMEM per core (trace-time query), conservative fallback."""
    try:
        return int(pltpu.get_tpu_info().vmem_capacity_bytes)
    except Exception:
        return 64 * 1024 * 1024  # v7x-sized fallback: safe on every generation


def _plan_tiles(B, F, H, itemsize, tb_max):
    """Pick the largest batch tile (multiple of 8, <= tb_max) whose
    double-buffered x tiles fit in a generation-aware VMEM budget, plus the
    vmem_limit_bytes to hand to Mosaic."""
    cap = _vmem_capacity_bytes()
    # ~48 MiB on v7x (64 MiB physical), ~96 MiB on v5e/v6e (128 MiB physical).
    vmem_target = int(min((cap * 3) // 4, 112 * 1024 * 1024))

    # Resident (grid-invariant) operands, double-buffered, (8,128)-padded.
    resident = 2 * (_round_up(F, 8) * _round_up(H, 128)      # W1
                    + 8 * _round_up(H, 128)                  # b1
                    + _round_up(H, 8) * 128                  # wh (lane-padded)
                    + 8 * 128) * 4                           # bh
    # Output double-buffer at the worst-case tile (lanes padded to 128).
    out_worst = 2 * tb_max * 128 * 4

    x_budget = vmem_target - resident - out_worst - 2 * 1024 * 1024
    x_budget = max(x_budget, 2 * 8 * F * itemsize)

    tb = max(8, (x_budget // (2 * F * itemsize)) // 8 * 8)
    tb = min(tb, tb_max, _round_up(B, 8))
    return int(tb), vmem_target


@functools.partial(jax.jit, static_argnames=("tb_max",))
def ann_forward(x, w1, b1, wc, bc, wr, br, *, tb_max=4096):
    """x: (B, F).  w1: (F, H), b1: (1, H), wc/wr: (H, 1), bc/br: (1, 1).

    Returns (o_cls, o_reg), each (B, 1) f32.
    """
    B, F = x.shape
    H = w1.shape[1]

    # Fuse the two 1-wide heads into one (H, 2) weight and a (1, 2) bias.
    # NOTE: heads stay f32 even if x is lower precision (intentional).
    wh = jnp.concatenate([wc, wr], axis=1).astype(jnp.float32)   # (H, 2)
    bh = jnp.concatenate([bc, br], axis=1).astype(jnp.float32)   # (1, 2)
    b1_in = b1.astype(jnp.float32)

    itemsize = jnp.dtype(x.dtype).itemsize
    tb, vmem_limit = _plan_tiles(B, F, H, itemsize, tb_max)

    # Non-divisible grid: the ragged last block is boundary-masked by Pallas.
    # OOB x rows read garbage, but rows are independent and OOB output rows
    # are never written back, so valid rows are unaffected.  No jnp.pad copy.
    grid = (pl.cdiv(B, tb),)

    full = lambda shape: pl.BlockSpec(shape, lambda i: (0, 0))

    fused = pl.pallas_call(
        ann_kernel,
        out_shape=jax.ShapeDtypeStruct((B, 2), jnp.float32),
        grid_spec=pltpu.PrefetchScalarGridSpec(
            num_scalar_prefetch=0,
            grid=grid,
            in_specs=[
                pl.BlockSpec((tb, F), lambda i: (i, 0)),   # x tile over batch
                full((F, H)),                              # W1 (resident)
                full((1, H)),                              # b1
                full((H, 2)),                              # fused head weights
                full((1, 2)),                              # fused head biases
            ],
            out_specs=pl.BlockSpec((tb, 2), lambda i: (i, 0)),
        ),
        compiler_params=pltpu.CompilerParams(
            dimension_semantics=("parallel",),
            vmem_limit_bytes=vmem_limit),
    )(x, w1, b1_in, wh, bh)

    o_cls = fused[:, 0:1]
    o_reg = fused[:, 1:2]
    return o_cls, o_reg


def ref_forward(x, w1, b1, wc, bc, wr, br):
    h = jnp.maximum(x @ w1 + b1, 0.0)
    o_cls = jax.nn.sigmoid(h @ wc + bc)
    o_reg = h @ wr + br
    return o_cls, o_reg


def _make_params(key, F, H):
    k1, k2, k3 = jax.random.split(key, 3)
    # Deterministic Linear init (normal(0, 0.01) weights, zero bias),
    # stored pre-transposed as (in, out) for row-major matmul.
    w1 = 0.01 * jax.random.normal(k1, (F, H), dtype=jnp.float32)
    b1 = jnp.zeros((1, H), dtype=jnp.float32)
    wc = 0.01 * jax.random.normal(k2, (H, 1), dtype=jnp.float32)
    bc = jnp.zeros((1, 1), dtype=jnp.float32)
    wr = 0.01 * jax.random.normal(k3, (H, 1), dtype=jnp.float32)
    br = jnp.zeros((1, 1), dtype=jnp.float32)
    return w1, b1, wc, bc, wr, br


if __name__ == "__main__":
    key = jax.random.PRNGKey(0)
    kx, kp, kx2, kp2, kx3, kp3 = jax.random.split(key, 6)

    # 1) Small aligned case (B multiple of 8, single grid step).
    B, F, H = 16, 256, 16
    x = jax.random.normal(kx, (B, F), dtype=jnp.float32)
    params = _make_params(kp, F, H)
    o_cls, o_reg = ann_forward(x, *params)
    jax.block_until_ready((o_cls, o_reg))
    r_cls, r_reg = ref_forward(x, *params)
    assert o_cls.shape == (B, 1) and o_reg.shape == (B, 1)
    assert jnp.allclose(o_cls, r_cls, atol=1e-5, rtol=1e-5)
    assert jnp.allclose(o_reg, r_reg, atol=1e-5, rtol=1e-5)

    # 2) Unaligned batch (B not a multiple of 8) — ragged single block.
    B2, F2, H2 = 20, 200, 16
    x2 = jax.random.normal(kx2, (B2, F2), dtype=jnp.float32)
    params2 = _make_params(kp2, F2, H2)
    o2_cls, o2_reg = ann_forward(x2, *params2)
    jax.block_until_ready((o2_cls, o2_reg))
    r2_cls, r2_reg = ref_forward(x2, *params2)
    assert o2_cls.shape == (B2, 1) and o2_reg.shape == (B2, 1)
    assert jnp.allclose(o2_cls, r2_cls, atol=1e-5, rtol=1e-5)
    assert jnp.allclose(o2_reg, r2_reg, atol=1e-5, rtol=1e-5)

    # 3) Multi-step grid with a ragged last tile (exercises cdiv path).
    B3, F3, H3 = 100, 189, 16
    x3 = jax.random.normal(kx3, (B3, F3), dtype=jnp.float32)
    params3 = _make_params(kp3, F3, H3)
    o3_cls, o3_reg = ann_forward(x3, *params3, tb_max=64)
    jax.block_until_ready((o3_cls, o3_reg))
    r3_cls, r3_reg = ref_forward(x3, *params3)
    assert o3_cls.shape == (B3, 1) and o3_reg.shape == (B3, 1)
    assert jnp.allclose(o3_cls, r3_cls, atol=1e-5, rtol=1e-5)
    assert jnp.allclose(o3_reg, r3_reg, atol=1e-5, rtol=1e-5)

    print("KERNEL_OK")
</pallas_src>

<mosaic_0001>
module attributes {stable_mosaic.version = 11 : i64} {
  func.func @ann_kernel(%arg0: i32, %arg1: memref<16x256xf32, #tpu.memory_space<vmem>>, %arg2: memref<256x16xf32, #tpu.memory_space<vmem>>, %arg3: memref<1x16xf32, #tpu.memory_space<vmem>>, %arg4: memref<16x2xf32, #tpu.memory_space<vmem>>, %arg5: memref<1x2xf32, #tpu.memory_space<vmem>>, %arg6: memref<16x2xf32, #tpu.memory_space<vmem>>) attributes {dimension_semantics = [#tpu.dimension_semantics<parallel>], iteration_bounds = array<i64: 1>, scalar_prefetch = 0 : i64, scratch_operands = 0 : i64, tpu.core_type = #tpu.core_type<tc>, window_params = [{transform_indices = @transform_0, window_bounds = array<i64: 16, 256>}, {pipeline_mode = #tpu.pipeline_mode<synchronous>, transform_indices = @transform_1, window_bounds = array<i64: 256, 16>}, {pipeline_mode = #tpu.pipeline_mode<synchronous>, transform_indices = @transform_2, window_bounds = array<i64: 1, 16>}, {pipeline_mode = #tpu.pipeline_mode<synchronous>, transform_indices = @transform_3, window_bounds = array<i64: 16, 2>}, {pipeline_mode = #tpu.pipeline_mode<synchronous>, transform_indices = @transform_4, window_bounds = array<i64: 1, 2>}, {transform_indices = @transform_5, window_bounds = array<i64: 16, 2>}]} {
    %c0 = arith.constant 0 : index
    %c0_0 = arith.constant 0 : index
    %0 = vector.load %arg1[%c0, %c0_0] : memref<16x256xf32, #tpu.memory_space<vmem>>, vector<16x256xf32>
    %c0_1 = arith.constant 0 : index
    %c0_2 = arith.constant 0 : index
    %1 = vector.load %arg2[%c0_1, %c0_2] : memref<256x16xf32, #tpu.memory_space<vmem>>, vector<256x16xf32>
    %cst = arith.constant dense<0.000000e+00> : vector<16x16xf32>
    %2 = tpu.matmul %0, %1, %cst {dimension_numbers = #tpu.dot_dimension_numbers<[1], [0], [0], [1], [0, 0, 1, 1], [], []>} : vector<16x256xf32>, vector<256x16xf32>, vector<16x16xf32> -> vector<16x16xf32>
    %c0_3 = arith.constant 0 : index
    %c0_4 = arith.constant 0 : index
    %3 = vector.load %arg3[%c0_3, %c0_4] : memref<1x16xf32, #tpu.memory_space<vmem>>, vector<1x16xf32>
    %4 = vector.broadcast %3 : vector<1x16xf32> to vector<16x16xf32>
    %5 = arith.addf %2, %4 : vector<16x16xf32>
    %cst_5 = arith.constant 0.000000e+00 : f32
    %6 = vector.broadcast %cst_5 : f32 to vector<16x16xf32>
    %7 = arith.maximumf %5, %6 : vector<16x16xf32>
    %c0_6 = arith.constant 0 : index
    %c0_7 = arith.constant 0 : index
    %8 = vector.load %arg4[%c0_6, %c0_7] : memref<16x2xf32, #tpu.memory_space<vmem>>, vector<16x2xf32>
    %cst_8 = arith.constant dense<0.000000e+00> : vector<16x2xf32>
    %9 = tpu.matmul %7, %8, %cst_8 {dimension_numbers = #tpu.dot_dimension_numbers<[1], [0], [0], [1], [0, 0, 1, 1], [], []>} : vector<16x16xf32>, vector<16x2xf32>, vector<16x2xf32> -> vector<16x2xf32>
    %c0_9 = arith.constant 0 : index
    %c0_10 = arith.constant 0 : index
    %10 = vector.load %arg5[%c0_9, %c0_10] : memref<1x2xf32, #tpu.memory_space<vmem>>, vector<1x2xf32>
    %11 = vector.broadcast %10 : vector<1x2xf32> to vector<16x2xf32>
    %12 = arith.addf %9, %11 : vector<16x2xf32>
    %13 = tpu.iota {dimensions = array<i32: 1>} : vector<16x2xi32>
    %c0_i32 = arith.constant 0 : i32
    %14 = vector.broadcast %c0_i32 : i32 to vector<16x2xi32>
    %15 = arith.cmpi eq, %13, %14 : vector<16x2xi32>
    %16 = arith.negf %12 : vector<16x2xf32>
    %17 = math.exp %16 : vector<16x2xf32>
    %cst_11 = arith.constant 1.000000e+00 : f32
    %18 = vector.broadcast %cst_11 : f32 to vector<16x2xf32>
    %19 = arith.addf %18, %17 : vector<16x2xf32>
    %20 = arith.divf %18, %19 : vector<16x2xf32>
    %21 = arith.select %15, %20, %12 : vector<16x2xi1>, vector<16x2xf32>
    %c0_12 = arith.constant 0 : index
    %c0_13 = arith.constant 0 : index
    %22 = vector.load %arg6[%c0_12, %c0_13] : memref<16x2xf32, #tpu.memory_space<vmem>>, vector<16x2xf32>
    tpu.vector_store %arg6[%c0_12, %c0_13], %21 {strides = array<i32>} : memref<16x2xf32, #tpu.memory_space<vmem>>, vector<16x2xf32>,
    return
  }
  func.func @transform_0(%arg0: i32) -> (i32, i32) {
    %c0_i32 = arith.constant 0 : i32
    %c0_i32_0 = arith.constant 0 : i32
    return %arg0, %c0_i32 : i32, i32
  }
  func.func @transform_1(%arg0: i32) -> (i32, i32) {
    %c0_i32 = arith.constant 0 : i32
    %c0_i32_0 = arith.constant 0 : i32
    %c0_i32_1 = arith.constant 0 : i32
    return %c0_i32, %c0_i32_0 : i32, i32
  }
  func.func @transform_2(%arg0: i32) -> (i32, i32) {
    %c0_i32 = arith.constant 0 : i32
    %c0_i32_0 = arith.constant 0 : i32
    %c0_i32_1 = arith.constant 0 : i32
    return %c0_i32, %c0_i32_0 : i32, i32
  }
  func.func @transform_3(%arg0: i32) -> (i32, i32) {
    %c0_i32 = arith.constant 0 : i32
    %c0_i32_0 = arith.constant 0 : i32
    %c0_i32_1 = arith.constant 0 : i32
    return %c0_i32, %c0_i32_0 : i32, i32
  }
  func.func @transform_4(%arg0: i32) -> (i32, i32) {
    %c0_i32 = arith.constant 0 : i32
    %c0_i32_0 = arith.constant 0 : i32
    %c0_i32_1 = arith.constant 0 : i32
    return %c0_i32, %c0_i32_0 : i32, i32
  }
  func.func @transform_5(%arg0: i32) -> (i32, i32) {
    %c0_i32 = arith.constant 0 : i32
    %c0_i32_0 = arith.constant 0 : i32
    return %arg0, %c0_i32 : i32, i32
  }
}

</mosaic_0001>

<bundles_post_ra>
// kernel: ann_forward.1
= control target key start
LH: loop header
LB: loop body
LE: loop exit
PB: predicated region body
PF: predicated region fallthrough
CT: control target
= control target key end

     0   :  { %vm149_vm0 = vcmask 130048   ;;  %vm248_vm2 = vcmask 15360   ;;  %s510_s1 = inlined_call_operand.vmem [shape: f32[256,16], index: 1, kind: input, shape index: {}]   ;;  %s511_s0 = inlined_call_operand.vmem [shape: f32[16,256], index: 0, kind: input, shape index: {}]   ;;  %s512_s3 = inlined_call_operand.vmem [shape: f32[16,2], index: 3, kind: input, shape index: {}]   ;;  %s513_s2 = inlined_call_operand.vmem [shape: f32[1,16], index: 2, kind: input, shape index: {}]   ;;  %s514_s4 = inlined_call_operand.vmem [shape: f32[1,2], index: 4, kind: input, shape index: {}]   ;;  %s515_s5 = inlined_call_operand.vmem [shape: f32[16,2], index: 5, kind: output, shape index: {}]  }
   0x1   :  { %v40_v0 = vld [vmem:[%s510_s1 + $0x80] sm:$0xff]  ;;  %v41_v1 = vld [vmem:[%s510_s1 + $0x88] sm:$0xff]  ;;  %v42_v5 = vld [vmem:[%s510_s1 + $0x90] sm:$0xff] }
   0x2   :  { %v24_v2 = vld [vmem:[%s510_s1] sm:$0xff]  ;;  %v310_v3 = vpack.c.bf16 %v41_v1, %v40_v0  ;;  %v25_v4 = vld [vmem:[%s510_s1 + $0x8] sm:$0xff]  ;;  %v43_v6 = vld [vmem:[%s510_s1 + $0x98] sm:$0xff] }
   0x3   :  { %v312_v7 = vpack.c.bf16 %v25_v4, %v24_v2  ;;  %v314_v8 = vpack.c.bf16 %v43_v6, %v42_v5  ;;  %v26_v9 = vld [vmem:[%s510_s1 + $0x10] sm:$0xff]  ;;  %v27_v10 = vld [vmem:[%s510_s1 + $0x18] sm:$0xff]  ;;  %v44_v11 = vld [vmem:[%s510_s1 + $0xa0] sm:$0xff] }
   0x4   :  { %311 = vmatprep.subr.bf16.mxu0 %v310_v3  ;;  %v45_v12 = vld [vmem:[%s510_s1 + $0xa8] sm:$0xff]  ;;  %v316_v13 = vpack.c.bf16 %v27_v10, %v26_v9  ;;  %v28_v15 = vld [vmem:[%s510_s1 + $0x20] sm:$0xff]  ;;  %v46_v17 = vld [vmem:[%s510_s1 + $0xb0] sm:$0xff] }
   0x5   :  { %313 = vmatpush3.bf16.msra.mxu0 %v312_v7  ;;  %v318_v14 = vpack.c.bf16 %v45_v12, %v44_v11  ;;  %v29_v16 = vld [vmem:[%s510_s1 + $0x28] sm:$0xff]  ;;  %v47_v18 = vld [vmem:[%s510_s1 + $0xb8] sm:$0xff]  ;;  %v30_v21 = vld [vmem:[%s510_s1 + $0x30] sm:$0xff] }
   0x6   :  { %315 = vmatprep.subr.bf16.mxu0 %v314_v8  ;;  %v320_v19 = vpack.c.bf16 %v29_v16, %v28_v15  ;;  %v322_v20 = vpack.c.bf16 %v47_v18, %v46_v17  ;;  %v31_v22 = vld [vmem:[%s510_s1 + $0x38] sm:$0xff]  ;;  %v48_v23 = vld [vmem:[%s510_s1 + $0xc0] sm:$0xff]  ;;  %v49_v24 = vld [vmem:[%s510_s1 + $0xc8] sm:$0xff] }
   0x7   :  { %v21_v25 = vld [vmem:[%s511_s0 + $0x8] sm:$0xff]  ;;  %v324_v26 = vpack.c.bf16 %v31_v22, %v30_v21  ;;  %v326_v27 = vpack.c.bf16 %v49_v24, %v48_v23  ;;  %v32_v28 = vld [vmem:[%s510_s1 + $0x40] sm:$0xff]  ;;  %v50_v30 = vld [vmem:[%s510_s1 + $0xd0] sm:$0xff] }
   0x8   :  { %127 = vmatprep.mubr.f32.mxu0 %v21_v25  ;;  %v33_v29 = vld [vmem:[%s510_s1 + $0x48] sm:$0xff]  ;;  %v51_v31 = vld [vmem:[%s510_s1 + $0xd8] sm:$0xff]  ;;  %v34_v34 = vld [vmem:[%s510_s1 + $0x50] sm:$0xff] }
   0x9   :  { %317 = vmatpush3.bf16.msra.mxu0 %v316_v13  ;;  %v328_v32 = vpack.c.bf16 %v33_v29, %v32_v28  ;;  %v330_v33 = vpack.c.bf16 %v51_v31, %v50_v30  ;;  %v35_v35 = vld [vmem:[%s510_s1 + $0x58] sm:$0xff]  ;;  %v52_v36 = vld [vmem:[%s510_s1 + $0xe0] sm:$0xff]  ;;  %v53_v37 = vld [vmem:[%s510_s1 + $0xe8] sm:$0xff]  ;;  %v231_v13 = vlaneseq }
   0xa   :  { %319 = vmatprep.subr.bf16.mxu0 %v318_v14  ;;  %v332_v38 = vpack.c.bf16 %v35_v35, %v34_v34  ;;  %v334_v39 = vpack.c.bf16 %v53_v37, %v52_v36  ;;  %v36_v40 = vld [vmem:[%s510_s1 + $0x60] sm:$0xff]  ;;  %v37_v41 = vld [vmem:[%s510_s1 + $0x68] sm:$0xff]  ;;  %v54_v42 = vld [vmem:[%s510_s1 + $0xf0] sm:$0xff] }
   0xb   :  { %v55_v43 = vld [vmem:[%s510_s1 + $0xf8] sm:$0xff]  ;;  %v336_v44 = vpack.c.bf16 %v37_v41, %v36_v40  ;;  %v38_v46 = vld [vmem:[%s510_s1 + $0x70] sm:$0xff]  ;;  %v20_v49 = vld [vmem:[%s511_s0] sm:$0xff]  ;;  %v232_v14 = vand.u32 127, %v231_v13 }
   0xc   :  { %v338_v45 = vpack.c.bf16 %v55_v43, %v54_v42  ;;  %v39_v47 = vld [vmem:[%s510_s1 + $0x78] sm:$0xff]  ;;  %v22_v51 = vld [vmem:[%s511_s0 + $0x10] sm:$0xff]  ;;  %v140_v52 = vld [vmem:[%s512_s3] sm:$0xff] }
   0xd   :  { %321 = vmatpush3.bf16.msra.mxu0 %v320_v19  ;;  %v340_v48 = vpack.c.bf16 %v39_v47, %v38_v46  ;;  %v23_v50 = vld [vmem:[%s511_s0 + $0x18] sm:$0xff]  ;;  %v141_v53 = vld [vmem:[%s512_s3 + $0x8] sm:$0xff]  ;;  %v255_v57 = vld [vmem:[%s513_s2] ss:$0 sm:$0xff]  ;;  %vm233_vm1 = vcmp.eq.s32.totalorder %v232_v14, 0 }
   0xe   :  { %323 = vmatprep.subr.bf16.mxu0 %v322_v20  ;;  %v342_v54 = vpack.c.bf16 %v141_v53, %v140_v52  ;;  %v256_v2 = vld [vmem:[%s514_s4] ss:$0 sm:$0xff] }
  0x10   :  { %343 = vmatprep.subr.bf16.mxu1 %v342_v54 }
  0x11   :  { %325 = vmatpush3.bf16.msra.mxu0 %v324_v26  ;;  %345 = vmatpush3.bf16.msra.mxu1 %v342_v54 }
  0x12   :  { %327 = vmatprep.subr.bf16.mxu0 %v326_v27 }
  0x15   :  { %329 = vmatpush3.bf16.msra.mxu0 %v328_v32 }
  0x16   :  { %331 = vmatprep.subr.bf16.mxu0 %v330_v33 }
  0x19   :  { %333 = vmatpush3.bf16.msra.mxu0 %v332_v38 }
  0x1a   :  { %335 = vmatprep.subr.bf16.mxu0 %v334_v39 }
  0x1d   :  { %337 = vmatpush3.bf16.msra.mxu0 %v336_v44 }
  0x1e   :  { %339 = vmatprep.subr.bf16.mxu0 %v338_v45 }
  0x21   :  { %341 = vmatpush3.bf16.msra.mxu0 %v340_v48 }
  0x24   :  { %128 = vmatmul.mubr.f32.vlgmr.msra.gmra.mrb[0].mxu0 %v20_v49 }
  0x25   :  { %132 = vmatprep.mubr.f32.mxu0 %v23_v50 }
  0x28   :  { %133 = vmatmul.mubr.f32.gmra.mrb[2].mxu0 %v22_v51 }
  0xf7   :  { %v293_v55 = vpop.f32.mrb[0].mxu0 }
  0xf8   :  { %v294_v56 = vpop.f32.mrb[1].mxu0 }
  0xf9   :  { %v295_v58 = vadd.f32 %v294_v56, %v293_v55 }
  0xfb   :  { %v296_v59 = vpop.f32.mrb[2].mxu0  ;;  %v130_v60 = vadd.f32 %v295_v58, %v255_v57 }
  0xfc   :  { %v297_v61 = vpop.f32.mrb[3].mxu0 }
  0xfd   :  { %v298_v62 = vadd.f32 %v297_v61, %v296_v59  ;;  %v138_v63 = vmax.f32 %v130_v60, 0.0 }
  0xff   :  { %v135_v0 = vadd.f32 %v298_v62, %v255_v57  ;;  %307 = vmatprep.mubr.msk.f32.mxu1 %vm149_vm0, %v138_v63 }
 0x101   :  { %v139_v1 = vmax.f32 %v135_v0, 0.0 }
 0x103   :  { %308 = vmatmul.mubr.msk.f32.vlgmr.msra.gmra.mrb[0].mxu1 %vm149_vm0, %v139_v1 }
 0x1d6   :  { %v309_v3 = vpop.f32.mrb[0].mxu1 }
 0x1d7   :  { %v228_v4 = vadd.f32 %v309_v3, %v256_v2  ;;  %v222_v5 = vpop.f32.mrb[1].mxu1 }
 0x1d8   :  { %v223_v6 = vadd.f32 %v256_v2, %v222_v5 }
 0x1d9   :  { %v260_v7 = vmul.f32 -1.442695, %v228_v4 }
 0x1da   :  { %v259_v8 = vmul.f32 -1.442695, %v223_v6 }
 0x1db   :  { %346 = vpow2.f32 %v260_v7 }
 0x1dc   :  { %348 = vpow2.f32 %v259_v8 }
 0x1e5   :  { %v347_v9 = vpop.eup %346 }
 0x1e6   :  { %v349_v10 = vpop.eup %348  ;;  %v241_v11 = vadd.f32 1.0, %v347_v9 }
 0x1e7   :  { %v240_v12 = vadd.f32 1.0, %v349_v10 }
 0x1e8   :  { %350 = vrcp.f32 %v241_v11 }
 0x1e9   :  { %352 = vrcp.f32 %v240_v12 }
 0x1f2   :  { %v351_v15 = vpop.eup %350 }
 0x1f3   :  { %v353_v16 = vpop.eup %352  ;;  %v247_v17 = vsel %vm233_vm1, %v351_v15, %v228_v4 }
 0x1f4   :  { %250 = vst.msk [vmem:[%s515_s5 + $0x8] sm:$0xff] %vm248_vm2, %v247_v17  ;;  %v246_v18 = vsel %vm233_vm1, %v353_v16, %v223_v6 }
 0x1f5   :  { %249 = vst.msk [vmem:[%s515_s5] sm:$0xff] %vm248_vm2, %v246_v18 }

</bundles_post_ra>
